<compile_context>
chip_gen: v7x
topology: tpu7x:2x2x1
jax: 0.10.0
libtpu: 0.0.40
codegen_flags: <defaults>
</compile_context>

<pallas_src>
import functools

import jax
import jax.numpy as jnp
from jax.experimental import pallas as pl
from jax.experimental.pallas import tpu as pltpu

KH, KW = 3, 3


def _round_up(x, m):
    return ((x + m - 1) // m) * m


def _conv3x3_kernel(w_ref, x_ref, o_ref, xp_ref, *,
                    Nb, H, W, Wp, Ho, Wo, Wscr, ph, pw, row_strip):
    """One grid step: Nb images, zero-padded and packed along the lane axis.

    w_ref : SMEM (9,)           f32 filter, row-major 3x3
    x_ref : VMEM (Nb, H, W)     unpadded input images for this step
    o_ref : VMEM (Nb, Ho, Wo)   per-image NCHW output (single HBM pass)
    xp_ref: VMEM (Hp, Wscr)     f32 scratch: zero-haloed, lane-packed input
    """
    Wacc = Wscr - (KW - 1)           # widest column window readable with +2 shift

    # ---- 1) Pack: write only the data regions of the scratch. ----
    for n in range(Nb):              # static unroll over images in this step
        c0 = n * Wp + pw
        xp_ref[ph:ph + H, c0:c0 + W] = x_ref[n].astype(jnp.float32)

    # ---- 2) Zero ONLY the halo (not the whole scratch). ----
    if ph > 0:
        xp_ref[0:ph, :] = jnp.zeros((ph, Wscr), jnp.float32)
        xp_ref[ph + H:ph + H + ph, :] = jnp.zeros((ph, Wscr), jnp.float32)
    if pw > 0:
        xp_ref[ph:ph + H, 0:pw] = jnp.zeros((H, pw), jnp.float32)
    for n in range(Nb):              # gaps between images + alignment tail
        g0 = n * Wp + pw + W
        g1 = (n + 1) * Wp + pw if n + 1 < Nb else Wscr
        if g1 > g0:
            xp_ref[ph:ph + H, g0:g1] = jnp.zeros((H, g1 - g0), jnp.float32)

    # ---- 3) Hoist the 9 filter scalars out of the tap loop (SMEM reads). ----
    w = [w_ref[i] for i in range(KH * KW)]

    # ---- 4) Row-strip 9-tap shifted MAC over the lane-dense slab. ----
    # Horizontal/vertical taps are sublane/lane-offset re-reads of xp_ref
    # (vld slots are under-used; keeps vreg pressure low).  Strips keep the
    # accumulator register-resident for large Ho*Wscr.
    for r0 in range(0, Ho, row_strip):
        rows = min(row_strip, Ho - r0)
        acc = jnp.zeros((rows, Wacc), jnp.float32)
        for ki in range(KH):
            for kj in range(KW):
                tap = xp_ref[r0 + ki:r0 + ki + rows, kj:kj + Wacc]
                acc = acc + w[ki * KW + kj] * tap
        # Per-image output stores: image n's output columns live at
        # acc[:, n*Wp : n*Wp + Wo]  (Wo = Wp - 2 always, so this is in range).
        for n in range(Nb):
            c0 = n * Wp
            o_ref[n, r0:r0 + rows, :] = acc[:, c0:c0 + Wo].astype(o_ref.dtype)


def conv2d_module_forward(x_nchw, weight, padding=(1, 1)):
    """Forward pass equivalent to Conv2DModule(padding).forward(x)."""
    N, C, H, W = x_nchw.shape
    assert C == 1, "Conv2DModule has in_channels = out_channels = 1"
    ph, pw = padding
    assert H + 2 * ph >= KH and W + 2 * pw >= KW
    Ho = H + 2 * ph - KH + 1
    Wo = W + 2 * pw - KW + 1
    Hp = H + 2 * ph
    Wp = W + 2 * pw

    # Images per grid step: FLOOR of lanes/Wp (not ceil), trying a few slab
    # widths and keeping the one with the best lane utilization.
    def _util(nb):
        return (nb * Wp) / _round_up(nb * Wp, 128)
    Nb = max((max(1, lanes // Wp) for lanes in (128, 256, 384)), key=_util)
    Nb = min(Nb, N)
    if N >= 2:
        # Guarantee >= 2 grid steps so both v7x TensorCores get work and the
        # input/output DMA pipeline has something to overlap.
        Nb = min(Nb, -(-N // 2))
    n_steps = -(-N // Nb)                       # ceil(N / Nb)
    Npad = n_steps * Nb
    Wscr = _round_up(Nb * Wp, 128)              # packed scratch width (lane-dense)

    # Row-strip size: keep acc (rows x Wscr f32) well inside the 64-vreg file.
    row_strip = min(Ho, max(8, 8192 // Wscr))

    x3 = x_nchw[:, 0, :, :]                     # (N, H, W), no spatial pad
    if Npad != N:
        # Pad the batch so the last grid block never reads out of bounds
        # (garbage images would be benign but this keeps it provably clean).
        x3 = jnp.concatenate(
            [x3, jnp.zeros((Npad - N, H, W), x3.dtype)], axis=0)
    w_flat = weight.reshape(KH * KW).astype(jnp.float32)      # (9,)

    kernel = functools.partial(
        _conv3x3_kernel,
        Nb=Nb, H=H, W=W, Wp=Wp, Ho=Ho, Wo=Wo, Wscr=Wscr, ph=ph, pw=pw,
        row_strip=row_strip)

    # Generation-aware VMEM limit: ~80% of physical capacity, but no more than
    # what the (double-buffered) blocks + scratch actually need (with margin).
    itemsize = jnp.dtype(x_nchw.dtype).itemsize
    block_bytes = (2 * Nb * H * W * itemsize        # double-buffered input block
                   + 2 * Nb * Ho * Wo * itemsize    # double-buffered output block
                   + Hp * Wscr * 4)                 # packed f32 scratch
    try:
        vmem_cap = int(pltpu.get_tpu_info().vmem_capacity_bytes)
    except Exception:                               # conservative fallback
        vmem_cap = 64 * 2**20
    vmem_limit = int(min((vmem_cap * 4) // 5, max(32 * 2**20, 4 * block_bytes)))

    ypack = pl.pallas_call(
        kernel,
        out_shape=jax.ShapeDtypeStruct((Npad, Ho, Wo), x_nchw.dtype),
        grid=(n_steps,),
        in_specs=[
            pl.BlockSpec(memory_space=pltpu.MemorySpace.SMEM),     # filter (9,)
            pl.BlockSpec((Nb, H, W), lambda b: (b, 0, 0)),         # image block
        ],
        out_specs=pl.BlockSpec((Nb, Ho, Wo), lambda b: (b, 0, 0)),
        scratch_shapes=[pltpu.VMEM((Hp, Wscr), jnp.float32)],
        compiler_params=pltpu.CompilerParams(
            dimension_semantics=("parallel",),
            vmem_limit_bytes=vmem_limit),
    )(w_flat, x3)

    # Only batch-padding removal + channel dim; no extra unpack HBM pass.
    return ypack[:N][:, None, :, :]                 # (N, 1, Ho, Wo)


if __name__ == "__main__":
    key = jax.random.PRNGKey(0)
    kx, kw = jax.random.split(key)

    # Small shapes consistent with the module: NCHW, in_channels = 1.
    x = jax.random.normal(kx, (2, 1, 16, 16), dtype=jnp.float32)
    # Conv2d weight shape: (out_c, in_c, 3, 3).
    weight = jax.random.normal(kw, (1, 1, 3, 3), dtype=jnp.float32) * 0.1

    y = conv2d_module_forward(x, weight, padding=(1, 1))
    y = jax.block_until_ready(y)

    # Reference check with XLA's conv (NCHW, OIHW), same padding semantics.
    y_ref = jax.lax.conv_general_dilated(
        x, weight, window_strides=(1, 1), padding=((1, 1), (1, 1)),
        dimension_numbers=("NCHW", "OIHW", "NCHW"))
    assert y.shape == (2, 1, 16, 16), y.shape
    assert jnp.allclose(y, y_ref, atol=1e-5, rtol=1e-5), "mismatch vs reference"

    print("KERNEL_OK")
</pallas_src>

<mosaic_0001>
module attributes {stable_mosaic.version = 11 : i64} {
  func.func @_conv3x3_kernel(%arg0: i32, %arg1: memref<9xf32, #tpu.memory_space<smem>>, %arg2: memref<1x16x16xf32, #tpu.memory_space<vmem>>, %arg3: memref<1x16x16xf32, #tpu.memory_space<vmem>>, %arg4: memref<18x128xf32, #tpu.memory_space<vmem>>) attributes {dimension_semantics = [#tpu.dimension_semantics<parallel>], iteration_bounds = array<i64: 2>, scalar_prefetch = 0 : i64, scratch_operands = 1 : i64, tpu.core_type = #tpu.core_type<tc>, window_params = [{transform_indices = @transform_0, window_bounds = array<i64: 9>}, {transform_indices = @transform_1, window_bounds = array<i64: 1, 16, 16>}, {transform_indices = @transform_2, window_bounds = array<i64: 1, 16, 16>}]} {
    %c0 = arith.constant 0 : index
    %c0_0 = arith.constant 0 : index
    %c0_1 = arith.constant 0 : index
    %0 = vector.load %arg2[%c0, %c0_0, %c0_1] : memref<1x16x16xf32, #tpu.memory_space<vmem>>, vector<1x16x16xf32>
    %1 = vector.shape_cast %0 : vector<1x16x16xf32> to vector<16x16xf32>
    %c1 = arith.constant 1 : index
    %c1_2 = arith.constant 1 : index
    %2 = vector.load %arg4[%c1, %c1_2] : memref<18x128xf32, #tpu.memory_space<vmem>>, vector<16x16xf32>
    tpu.vector_store %arg4[%c1, %c1_2], %1 {strides = array<i32>} : memref<18x128xf32, #tpu.memory_space<vmem>>, vector<16x16xf32>,
    %cst = arith.constant 0.000000e+00 : f32
    %3 = vector.broadcast %cst : f32 to vector<1x128xf32>
    %c0_3 = arith.constant 0 : index
    %c0_4 = arith.constant 0 : index
    %4 = vector.load %arg4[%c0_3, %c0_4] : memref<18x128xf32, #tpu.memory_space<vmem>>, vector<1x128xf32>
    tpu.vector_store %arg4[%c0_3, %c0_4], %3 {strides = array<i32>} : memref<18x128xf32, #tpu.memory_space<vmem>>, vector<1x128xf32>,
    %cst_5 = arith.constant 0.000000e+00 : f32
    %5 = vector.broadcast %cst_5 : f32 to vector<1x128xf32>
    %c17 = arith.constant 17 : index
    %c0_6 = arith.constant 0 : index
    %6 = vector.load %arg4[%c17, %c0_6] : memref<18x128xf32, #tpu.memory_space<vmem>>, vector<1x128xf32>
    tpu.vector_store %arg4[%c17, %c0_6], %5 {strides = array<i32>} : memref<18x128xf32, #tpu.memory_space<vmem>>, vector<1x128xf32>,
    %cst_7 = arith.constant 0.000000e+00 : f32
    %7 = vector.broadcast %cst_7 : f32 to vector<16x1xf32>
    %c1_8 = arith.constant 1 : index
    %c0_9 = arith.constant 0 : index
    %8 = vector.load %arg4[%c1_8, %c0_9] : memref<18x128xf32, #tpu.memory_space<vmem>>, vector<16x1xf32>
    tpu.vector_store %arg4[%c1_8, %c0_9], %7 {strides = array<i32>} : memref<18x128xf32, #tpu.memory_space<vmem>>, vector<16x1xf32>,
    %cst_10 = arith.constant 0.000000e+00 : f32
    %9 = vector.broadcast %cst_10 : f32 to vector<16x111xf32>
    %c1_11 = arith.constant 1 : index
    %c17_12 = arith.constant 17 : index
    %10 = vector.load %arg4[%c1_11, %c17_12] : memref<18x128xf32, #tpu.memory_space<vmem>>, vector<16x111xf32>
    tpu.vector_store %arg4[%c1_11, %c17_12], %9 {strides = array<i32>} : memref<18x128xf32, #tpu.memory_space<vmem>>, vector<16x111xf32>,
    %c0_13 = arith.constant 0 : index
    %11 = memref.load %arg1[%c0_13] : memref<9xf32, #tpu.memory_space<smem>>
    %c1_14 = arith.constant 1 : index
    %12 = memref.load %arg1[%c1_14] : memref<9xf32, #tpu.memory_space<smem>>
    %c2 = arith.constant 2 : index
    %13 = memref.load %arg1[%c2] : memref<9xf32, #tpu.memory_space<smem>>
    %c3 = arith.constant 3 : index
    %14 = memref.load %arg1[%c3] : memref<9xf32, #tpu.memory_space<smem>>
    %c4 = arith.constant 4 : index
    %15 = memref.load %arg1[%c4] : memref<9xf32, #tpu.memory_space<smem>>
    %c5 = arith.constant 5 : index
    %16 = memref.load %arg1[%c5] : memref<9xf32, #tpu.memory_space<smem>>
    %c6 = arith.constant 6 : index
    %17 = memref.load %arg1[%c6] : memref<9xf32, #tpu.memory_space<smem>>
    %c7 = arith.constant 7 : index
    %18 = memref.load %arg1[%c7] : memref<9xf32, #tpu.memory_space<smem>>
    %c8 = arith.constant 8 : index
    %19 = memref.load %arg1[%c8] : memref<9xf32, #tpu.memory_space<smem>>
    %cst_15 = arith.constant 0.000000e+00 : f32
    %20 = vector.broadcast %cst_15 : f32 to vector<16x126xf32>
    %c0_16 = arith.constant 0 : index
    %c0_17 = arith.constant 0 : index
    %21 = vector.load %arg4[%c0_16, %c0_17] : memref<18x128xf32, #tpu.memory_space<vmem>>, vector<16x126xf32>
    %22 = vector.broadcast %11 : f32 to vector<16x126xf32>
    %23 = arith.mulf %22, %21 : vector<16x126xf32>
    %24 = arith.addf %20, %23 : vector<16x126xf32>
    %c0_18 = arith.constant 0 : index
    %c1_19 = arith.constant 1 : index
    %25 = vector.load %arg4[%c0_18, %c1_19] : memref<18x128xf32, #tpu.memory_space<vmem>>, vector<16x126xf32>
    %26 = vector.broadcast %12 : f32 to vector<16x126xf32>
    %27 = arith.mulf %26, %25 : vector<16x126xf32>
    %28 = arith.addf %24, %27 : vector<16x126xf32>
    %c0_20 = arith.constant 0 : index
    %c2_21 = arith.constant 2 : index
    %29 = vector.load %arg4[%c0_20, %c2_21] : memref<18x128xf32, #tpu.memory_space<vmem>>, vector<16x126xf32>
    %30 = vector.broadcast %13 : f32 to vector<16x126xf32>
    %31 = arith.mulf %30, %29 : vector<16x126xf32>
    %32 = arith.addf %28, %31 : vector<16x126xf32>
    %c1_22 = arith.constant 1 : index
    %c0_23 = arith.constant 0 : index
    %33 = vector.load %arg4[%c1_22, %c0_23] : memref<18x128xf32, #tpu.memory_space<vmem>>, vector<16x126xf32>
    %34 = vector.broadcast %14 : f32 to vector<16x126xf32>
    %35 = arith.mulf %34, %33 : vector<16x126xf32>
    %36 = arith.addf %32, %35 : vector<16x126xf32>
    %c1_24 = arith.constant 1 : index
    %c1_25 = arith.constant 1 : index
    %37 = vector.load %arg4[%c1_24, %c1_25] : memref<18x128xf32, #tpu.memory_space<vmem>>, vector<16x126xf32>
    %38 = vector.broadcast %15 : f32 to vector<16x126xf32>
    %39 = arith.mulf %38, %37 : vector<16x126xf32>
    %40 = arith.addf %36, %39 : vector<16x126xf32>
    %c1_26 = arith.constant 1 : index
    %c2_27 = arith.constant 2 : index
    %41 = vector.load %arg4[%c1_26, %c2_27] : memref<18x128xf32, #tpu.memory_space<vmem>>, vector<16x126xf32>
    %42 = vector.broadcast %16 : f32 to vector<16x126xf32>
    %43 = arith.mulf %42, %41 : vector<16x126xf32>
    %44 = arith.addf %40, %43 : vector<16x126xf32>
    %c2_28 = arith.constant 2 : index
    %c0_29 = arith.constant 0 : index
    %45 = vector.load %arg4[%c2_28, %c0_29] : memref<18x128xf32, #tpu.memory_space<vmem>>, vector<16x126xf32>
    %46 = vector.broadcast %17 : f32 to vector<16x126xf32>
    %47 = arith.mulf %46, %45 : vector<16x126xf32>
    %48 = arith.addf %44, %47 : vector<16x126xf32>
    %c2_30 = arith.constant 2 : index
    %c1_31 = arith.constant 1 : index
    %49 = vector.load %arg4[%c2_30, %c1_31] : memref<18x128xf32, #tpu.memory_space<vmem>>, vector<16x126xf32>
    %50 = vector.broadcast %18 : f32 to vector<16x126xf32>
    %51 = arith.mulf %50, %49 : vector<16x126xf32>
    %52 = arith.addf %48, %51 : vector<16x126xf32>
    %c2_32 = arith.constant 2 : index
    %c2_33 = arith.constant 2 : index
    %53 = vector.load %arg4[%c2_32, %c2_33] : memref<18x128xf32, #tpu.memory_space<vmem>>, vector<16x126xf32>
    %54 = vector.broadcast %19 : f32 to vector<16x126xf32>
    %55 = arith.mulf %54, %53 : vector<16x126xf32>
    %56 = arith.addf %52, %55 : vector<16x126xf32>
    %57 = vector.extract_strided_slice %56 {offsets = [0, 0], sizes = [16, 16], strides = [1, 1]} : vector<16x126xf32> to vector<16x16xf32>
    %c0_34 = arith.constant 0 : index
    %c0_35 = arith.constant 0 : index
    %c0_36 = arith.constant 0 : index
    %58 = vector.load %arg3[%c0_34, %c0_35, %c0_36] : memref<1x16x16xf32, #tpu.memory_space<vmem>>, vector<1x16x16xf32>
    %59 = vector.shape_cast %58 : vector<1x16x16xf32> to vector<16x16xf32>
    %60 = vector.shape_cast %57 : vector<16x16xf32> to vector<1x16x16xf32>
    tpu.vector_store %arg3[%c0_34, %c0_35, %c0_36], %60 {strides = array<i32>} : memref<1x16x16xf32, #tpu.memory_space<vmem>>, vector<1x16x16xf32>,
    return
  }
  func.func @transform_0(%arg0: i32) -> i32 {
    %c0_i32 = arith.constant 0 : i32
    %c0_i32_0 = arith.constant 0 : i32
    return %c0_i32 : i32
  }
  func.func @transform_1(%arg0: i32) -> (i32, i32, i32) {
    %c0_i32 = arith.constant 0 : i32
    %c0_i32_0 = arith.constant 0 : i32
    %c0_i32_1 = arith.constant 0 : i32
    return %arg0, %c0_i32, %c0_i32_0 : i32, i32, i32
  }
  func.func @transform_2(%arg0: i32) -> (i32, i32, i32) {
    %c0_i32 = arith.constant 0 : i32
    %c0_i32_0 = arith.constant 0 : i32
    %c0_i32_1 = arith.constant 0 : i32
    return %arg0, %c0_i32, %c0_i32_0 : i32, i32, i32
  }
}

</mosaic_0001>

<bundles_post_ra>
// kernel: tpu_custom_call.1
= control target key start
LH: loop header
LB: loop body
LE: loop exit
PB: predicated region body
PF: predicated region fallthrough
CT: control target
= control target key end

     0   :  { %7 = vsyncpa [#allocation6], 0  ;;  %s849_s0 = inlined_call_operand.hbm [shape: f32[9], index: 0, kind: input, shape index: {}]   ;;  %s850_s1 = inlined_call_operand.hbm [shape: f32[2,16,16], index: 1, kind: input, shape index: {}]   ;;  %s851_s2 = inlined_call_operand.hbm [shape: f32[2,16,16], index: 2, kind: output, shape index: {}]  }
   0x1   :  { %8 = vsyncpa [#allocation4], 0 }
   0x2   :  { %10 = vsyncpa [#allocation4 + $0x1], 0 }
   0x3   :  { %11 = vsyncpa [#allocation5], 0 }
   0x4   :  { %13 = vsyncpa [#allocation5 + $0x1], 0  ;;  %s637_s9 = smov 0   ;;  %s639_s10 = smov 0  }
   0x5   :  { %s641_s11 = smov 0   ;;  %s643_s12 = smov 0  }
   0x6 LB: > { %s658_s13 = sadd.s32 4294967295, %s609_s12   ;;  %s405_s14 = sadd.s32 4294967294, %s609_s12   ;;  %s609_s12 = sphi %s643_s12, %s871_s12   ;;  %s605_s11 = sphi %s641_s11, %s870_s11   ;;  %s601_s10 = sphi %s639_s10, %s869_s10   ;;  %s597_s9 = sphi %s637_s9, %s868_s9  }
   0x7   : > { %s662_s15 = sadd.s32 1, %s609_s12   ;;  %s47_s16 = sadd.s32 1, %s605_s11 }
   0x8   : > { %s44_s17 = ssub.s32 %s609_s12, %s662_s15  ;;  %p54_p0 = scmp.ne.s32.totalorder %s605_s11, %s601_s10 }
   0x9   : > { %p45_p1 = scmp.eq.s32.totalorder %s44_s17, 0  ;;  %p55_p2 = scmp.eq.s32.totalorder %s609_s12, 0 }
   0xa   : > { %p60_p3 = scmp.ne.s32.totalorder %s601_s10, %s597_s9  ;;  %p852_p4 = scmp.eq.s32.totalorder %s658_s13, 0 }
   0xb   : > { %s674_s18 = scalar_select %p45_p1, %s605_s11, %s47_s16  }
   0xc   : > { %p676_p5 = por %p55_p2, %p54_p0  ;;  %p682_p6 = por %p852_p4, %p60_p3 }
   0xd   : > { %p84_p7 = scmp.eq.s32.totalorder %s658_s13, 1  ;;  %p90_p8 = scmp.eq.s32.totalorder %s405_s14, 1 }
   0xe   : > { %s856_s20 = scalar_select %p682_p6, 1, 0 }
   0xf   : > { %p406_p9 = scmp.ge.s32.totalorder %s609_s12, 1  ;;  %p97_p10 = scmp.lt.s32.totalorder %s609_s12, 3 }
  0x10   : > { %p689_p11 = por %p84_p7, %p54_p0  ;;  %p693_p12 = por %p90_p8, %p60_p3 }
  0x11   : > { %p697_p13 = pnand %p406_p9, %p97_p10  ;;  %p452_p4 = scmp.lt.s32.totalorder %s609_s12, 2 }
  0x12   : > { %s857_s21 = scalar_select %p689_p11, 1, 0 }
  0x13   : > { %s858_s22 = scalar_select %p693_p12, 1, 0 }
  0x14   : > { %p439_p2 = pneg %p697_p13  ;;  %s119_s24 = sand.u32 1, %s605_s11  }
  0x15   : > { %s429_s25 = sshll.u32 %s609_s12, 8  ;;  %p860_p6 = scmp.eq.s32.totalorder %s658_s13, 0 }
  0x16   : > { %p711_p7 = pnand %p452_p4, %p676_p5  ;;  %s409_s27 = sshll.u32 %s119_s24, 4 }
  0x17   : > { %p440_p0 = pnand %p439_p2, %p860_p6  ;;  %s496_s30 = scalar_lea.hbm %s849_s0, 16 }
  0x18   : > { %p497_p3 = scmp.ne.s32.totalorder %s849_s0, %s496_s30  ;;  %p503_p6 = scmp.lt.u32.totalorder %s496_s30, %s849_s0 }
  0x19   : > { %p498_p8 = pneg %p440_p0 }
  0x1b   : > { %p499_p9 = pnand %p498_p8, %p497_p3 }
  0x1d   : > { %p500_p10 = pneg %p499_p9 }
  0x1f   : > { %p505_p4 = pnand %p503_p6, %p500_p10 }
  0x21   : > { %508 = shalt.err (!%p505_p4)
}
  0x22   : > { %s611_s7 = smov [#allocation3]   ;;  %s730_s19 = scalar_lea.hbm %s850_s1, %s429_s25 }
  0x23   : > { %442 = dma.hbm_to_smem (!%p440_p0), %s849_s0, 16, %s611_s7, [#allocation6]  }
  0x24   : > { %s123_s28 = scalar_lea.vmem [#allocation7], %s409_s27  ;;  %s734_s30 = scalar_lea.sflag [#allocation4], %s119_s24 }
  0x25   : > { %s130_s29 = sshll.u32 %s123_s28, 4  ;;  %s509_s3 = scalar_lea.hbm %s730_s19, 256  ;;  %s732_s29 = int_to_ptr.vmem [resolvable:$true] %s130_s29 }
  0x26   : > { %p510_p5 = scmp.ne.s32.totalorder %s730_s19, %s509_s3  ;;  %p511_p2 = pneg %p711_p7 }
  0x27   : > { %s514_s5 = scalar_lea.hbm %s850_s1, 512  ;;  %p515_p8 = scmp.lt.u32.totalorder %s730_s19, %s850_s1 }
  0x28   : > { %p512_p0 = pnand %p511_p2, %p510_p5  ;;  %p516_p9 = scmp.lt.u32.totalorder %s514_s5, %s509_s3 }
  0x29   : > { %p518_p6 = scmp.lt.u32.totalorder %s509_s3, %s730_s19 }
  0x2a   : > { %p513_p3 = pneg %p512_p0  ;;  %p517_p10 = por %p516_p9, %p515_p8 }
  0x2c   : > { %p519_p4 = por %p518_p6, %p517_p10 }
  0x2e   : > { %p520_p1 = pnand %p519_p4, %p513_p3 }
  0x30   : > { %523 = shalt.err (!%p520_p1)
}
  0x31   : > { %s524_s24 = scalar_lea.vmem %s732_s29, 256  ;;  %s612_s27 = smov [#allocation7]  }
  0x32   : > { %p525_p5 = scmp.ne.s32.totalorder %s732_s29, %s524_s24  ;;  %s529_s8 = sshll.u32 %s612_s27, 4  ;;  %s530_s8 = int_to_ptr.vmem [resolvable:$false] %s529_s8 }
  0x33   : > { %s531_s14 = scalar_lea.vmem %s530_s8, 512  ;;  %p532_p11 = scmp.lt.s32.totalorder %s732_s29, %s530_s8 }
  0x34   : > { %p527_p0 = pnand %p525_p5, %p511_p2  ;;  %p533_p8 = scmp.lt.s32.totalorder %s531_s14, %s524_s24 }
  0x36   : > { %p528_p12 = pneg %p527_p0  ;;  %p534_p9 = por %p533_p8, %p532_p11 }
  0x38   : > { %p535_p10 = pnand %p534_p9, %p528_p12 }
  0x3a   : > { %538 = shalt.err (!%p535_p10)
}
  0x3b   : > { %s613_s16 = smov 128   ;;  %s614_s17 = smov 8  }
  0x3c   : > { %446 = dma.hbm_to_vmem [thread:$0]  (!%p711_p7), %s730_s19, 256, %s732_s29, %s734_s30, %s613_s16, %s613_s16, %s614_s17  }
  0x3d   : > { %142 = sbr.rel (%p697_p13) target bundleno = 359 (0x167), region = 28  ;;  %p862_p1 = scmp.eq.s32.totalorder (!%p697_p13), %s658_s13, 0 }
  0x44   : > { %584 = dma.done.wait (%p862_p1), [#allocation6], 16   ;;  %p863_p2 = pmov %p862_p1 }
  0x45   : > { %s769_s28 = sand.u32 1, %s601_s10   ;;  %p864_p11 = scmp.ne.s32.totalorder %s856_s20, 0 }
  0x46   : > { %586 = vsyncadd (%p863_p2), [#allocation6], 4294967280  ;;  %s414_s3 = sshll.u32 %s769_s28, 4  ;;  %s149_s25 = scalar_lea.sflag [#allocation4], %s769_s28 }
  0x47   : > { %s152_s26 = scalar_lea.vmem [#allocation7], %s414_s3 }
  0x48   : > { %588 = dma.done.wait (%p864_p11), %s149_s25, 256  }
  0x49   : > { %590 = vsyncadd (%p864_p11), %s149_s25, 4294967040 }
  0x4a   : > { %157 = sfence }
  0x4b   : > { %v174_v0 = vld [vmem:[%s152_s26] sm:$0xff]  ;;  %s615_s23 = smov 1   ;;  %v616_v1 = vmov 0.0   ;;  %v175_v2 = vld [vmem:[%s152_s26 + $0x8] sm:$0xff]  ;;  %vm184_vm0 = vcmask 138248   ;;  %vm189_vm1 = vcmask 7168  }
  0x4c   : > { %178 = vrot.lane.b32.xlu0 %v174_v0, %s615_s23  ;;  %187 = vst [vmem:[#allocation2] sm:$0x1] %v616_v1  ;;  %188 = vst [vmem:[#allocation2 + $0x11] sm:$0x1] %v616_v1  ;;  %vm192_vm2 = vcmask 1047688   ;;  %s779_s19 = sld [smem:[#allocation3 + $0x2]] }
  0x4d   : > { %s416_s29 = sld [smem:[#allocation3 + $0x1]]  ;;  %s781_s20 = sld [smem:[#allocation3 + $0x4]]  ;;  %vm303_vm3 = vcmask 130048  }
  0x4e   : > { %s783_s30 = sld [smem:[#allocation3 + $0x5]]  ;;  %s787_s4 = sld [smem:[#allocation3 + $0x7]] }
  0x4f   : > { %s617_s5 = smov 126   ;;  %s618_s6 = smov 127  }
  0x50   : > { %180 = vrot.lane.b32.xlu0 %v175_v2, %s615_s23  ;;  %s423_s7 = sld [smem:[#allocation3 + $0x8]]  ;;  %s418_s27 = sld [smem:[#allocation3 + $0x3]] }
  0x51   : > { %s195_s24 = sld [smem:[#allocation3]]  ;;  %s421_s8 = sld [smem:[#allocation3 + $0x6]] }
  0x52   : > { %v224_v5 = vstv %s779_s19  ;;  %s173_s14 = scalar_lea.vmem [#allocation8], %s414_s3  ;;  %s430_s17 = sshll.u32 %s658_s13, 8 }
  0x53   : > { %v211_v6 = vstv %s416_s29  ;;  %v244_v9 = vstv %s781_s20  ;;  %s320_s16 = sshll.u32 %s173_s14, 4  ;;  %s805_s23 = scalar_lea.hbm %s851_s2, %s430_s17  ;;  %s800_s16 = int_to_ptr.vmem [resolvable:$true] %s320_s16 }
  0x54   : > { %v257_v14 = vstv %s783_s30  ;;  %v277_v19 = vstv %s787_s4  ;;  %s307_s3 = scalar_lea.sflag [#allocation5], %s769_s28  ;;  %s539_s19 = scalar_lea.vmem %s800_s16, 256 }
  0x55   : > { %p540_p12 = scmp.ne.s32.totalorder %s800_s16, %s539_s19  ;;  %p865_p13 = scmp.ne.s32.totalorder %s857_s21, 0 }
  0x56   : > { %v290_v23 = vstv %s423_s7  ;;  %v239_v31 = vstv %s418_s27  ;;  %s619_s13 = smov [#allocation8]  }
  0x57   : > { %v206_v29 = vstv %s195_s24  ;;  %v272_v40 = vstv %s421_s8  ;;  %p541_p7 = pnand %p540_p12, %p865_p13  ;;  %s543_s29 = sshll.u32 %s619_s13, 4  ;;  %s544_s29 = int_to_ptr.vmem [resolvable:$false] %s543_s29 }
  0x58   : > { %s545_s20 = scalar_lea.vmem %s544_s29, 512  ;;  %p546_p6 = scmp.lt.s32.totalorder %s800_s16, %s544_s29 }
  0x59   : > { %p542_p3 = pneg %p541_p7  ;;  %p547_p4 = scmp.lt.s32.totalorder %s545_s20, %s539_s19 }
  0x5b   : > { %p548_p5 = por %p547_p4, %p546_p6 }
  0x5d   : > { %p549_p0 = pnand %p548_p5, %p542_p3 }
  0xbe   : > { %v179_v3 = vpop.permute.xlu0 %178 }
  0xbf   : > { %185 = vst.msk [vmem:[#allocation2 + $0x1] sm:$0xff] %vm184_vm0, %v179_v3 }
  0xc0   : > { %190 = vst.msk [vmem:[#allocation2 + $0x1] sm:$0xff] %vm189_vm1, %v616_v1 }
  0xc1   : > { %193 = vst.msk [vmem:[#allocation2 + $0x1] sm:$0xff] %vm192_vm2, %v616_v1 }
  0xc2   : > { %v181_v4 = vpop.permute.xlu0 %180 }
  0xc3   : > { %186 = vst.msk [vmem:[#allocation2 + $0x9] sm:$0xff] %vm184_vm0, %v181_v4 }
  0xc4   : > { %191 = vst.msk [vmem:[#allocation2 + $0x9] sm:$0xff] %vm189_vm1, %v616_v1 }
  0xc5   : > { %194 = vst.msk [vmem:[#allocation2 + $0x9] sm:$0xff] %vm192_vm2, %v616_v1 }
  0xc8   : > { %v204_v7 = vld [vmem:[#allocation2] sm:$0xff] }
  0xc9   : > { %v237_v8 = vld [vmem:[#allocation2 + $0x1] sm:$0xff]  ;;  %v225_v10 = vmul.f32 %v224_v5, %v204_v7  ;;  %v212_v11 = vmul.f32 %v211_v6, %v204_v7  ;;  %v207_v30 = vmul.f32 %v206_v29, %v204_v7 }
  0xca   : > { %v245_v12 = vmul.f32 %v244_v9, %v237_v8  ;;  %v258_v16 = vmul.f32 %v257_v14, %v237_v8  ;;  %v240_v35 = vmul.f32 %v239_v31, %v237_v8 }
  0xcb   : > { %229 = vrot.lane.b32.xlu0 %v225_v10, %s617_s5  ;;  %216 = vrot.lane.b32.xlu1 %v212_v11, %s618_s6 }
  0xcc   : > { %v205_v13 = vld [vmem:[#allocation2 + $0x8] sm:$0xff] }
  0xcd   : > { %v213_v15 = vmul.f32 %v211_v6, %v205_v13  ;;  %v226_v17 = vmul.f32 %v224_v5, %v205_v13  ;;  %v270_v18 = vld [vmem:[#allocation2 + $0x2] sm:$0xff]  ;;  %v271_v26 = vld [vmem:[#allocation2 + $0xa] sm:$0xff]  ;;  %v208_v37 = vmul.f32 %v206_v29, %v205_v13 }
  0xce   : > { %v238_v20 = vld [vmem:[#allocation2 + $0x9] sm:$0xff]  ;;  %v278_v21 = vmul.f32 %v277_v19, %v270_v18  ;;  %v291_v24 = vmul.f32 %v290_v23, %v270_v18  ;;  %v279_v27 = vmul.f32 %v277_v19, %v271_v26  ;;  %v292_v28 = vmul.f32 %v290_v23, %v271_v26 }
  0xcf   : > { %249 = vrot.lane.b32.xlu0 %v245_v12, %s618_s6  ;;  %218 = vrot.lane.b32.xlu1 %v213_v15, %s618_s6  ;;  %v246_v22 = vmul.f32 %v244_v9, %v238_v20  ;;  %v259_v25 = vmul.f32 %v257_v14, %v238_v20  ;;  %v241_v44 = vmul.f32 %v239_v31, %v238_v20 }
  0xd0   : > { %v273_v45 = vmul.f32 %v272_v40, %v270_v18  ;;  %v274_v56 = vmul.f32 %v272_v40, %v271_v26 }
  0xd3   : > { %262 = vrot.lane.b32.xlu0 %v258_v16, %s617_s5  ;;  %231 = vrot.lane.b32.xlu1 %v226_v17, %s617_s5 }
  0xd7   : > { %282 = vrot.lane.b32.xlu0 %v278_v21, %s618_s6  ;;  %251 = vrot.lane.b32.xlu1 %v246_v22, %s618_s6 }
  0xdb   : > { %295 = vrot.lane.b32.xlu0 %v291_v24, %s617_s5  ;;  %264 = vrot.lane.b32.xlu1 %v259_v25, %s617_s5 }
  0xdf   : > { %284 = vrot.lane.b32.xlu1 %v279_v27, %s618_s6 }
  0xe3   : > { %297 = vrot.lane.b32.xlu1 %v292_v28, %s617_s5 }
 0x13d   : > { %v217_v32 = vpop.permute.xlu1 %216  ;;  %v230_v33 = vpop.permute.xlu0 %229 }
 0x13e   : > { %v222_v34 = vadd.f32 %v217_v32, %v207_v30 }
 0x140   : > { %v235_v36 = vadd.f32 %v230_v33, %v222_v34 }
 0x141   : > { %v219_v38 = vpop.permute.xlu1 %218  ;;  %v250_v39 = vpop.permute.xlu0 %249 }
 0x142   : > { %v242_v41 = vadd.f32 %v240_v35, %v235_v36  ;;  %v223_v42 = vadd.f32 %v219_v38, %v208_v37 }
 0x144   : > { %v255_v43 = vadd.f32 %v250_v39, %v242_v41 }
 0x145   : > { %v232_v46 = vpop.permute.xlu1 %231  ;;  %v263_v47 = vpop.permute.xlu0 %262 }
 0x146   : > { %v236_v48 = vadd.f32 %v232_v46, %v223_v42  ;;  %v268_v49 = vadd.f32 %v263_v47, %v255_v43 }
 0x148   : > { %v243_v50 = vadd.f32 %v241_v44, %v236_v48  ;;  %v275_v51 = vadd.f32 %v273_v45, %v268_v49 }
 0x149   : > { %v252_v52 = vpop.permute.xlu1 %251  ;;  %v283_v53 = vpop.permute.xlu0 %282 }
 0x14a   : > { %v256_v54 = vadd.f32 %v252_v52, %v243_v50  ;;  %v288_v55 = vadd.f32 %v283_v53, %v275_v51 }
 0x14d   : > { %v265_v57 = vpop.permute.xlu1 %264  ;;  %v296_v58 = vpop.permute.xlu0 %295 }
 0x14e   : > { %v269_v59 = vadd.f32 %v265_v57, %v256_v54  ;;  %v301_v60 = vadd.f32 %v296_v58, %v288_v55 }
 0x150   : > { %304 = vst.msk [vmem:[%s173_s14] sm:$0xff] %vm303_vm3, %v301_v60  ;;  %v276_v61 = vadd.f32 %v274_v56, %v269_v59 }
 0x151   : > { %v285_v62 = vpop.permute.xlu1 %284 }
 0x152   : > { %v289_v63 = vadd.f32 %v285_v62, %v276_v61 }
 0x155   : > { %v298_v0 = vpop.permute.xlu1 %297 }
 0x156   : > { %v302_v1 = vadd.f32 %v298_v0, %v289_v63 }
 0x158   : > { %305 = vst.msk [vmem:[%s173_s14 + $0x8] sm:$0xff] %vm303_vm3, %v302_v1 }
 0x159   : > { %552 = shalt.err (!%p549_p0)
}
 0x15a   : > { %s553_s30 = scalar_lea.hbm %s805_s23, 256  ;;  %s557_s6 = scalar_lea.hbm %s851_s2, 512 }
 0x15b   : > { %p554_p8 = scmp.ne.s32.totalorder %s805_s23, %s553_s30  ;;  %p558_p1 = scmp.lt.u32.totalorder %s805_s23, %s851_s2 }
 0x15c   : > { %p559_p2 = scmp.lt.u32.totalorder %s557_s6, %s553_s30  ;;  %p561_p12 = scmp.lt.u32.totalorder %s553_s30, %s805_s23 }
 0x15d   : > { %p555_p9 = pnand %p554_p8, %p865_p13 }
 0x15e   : > { %p560_p11 = por %p559_p2, %p558_p1 }
 0x15f   : > { %p556_p10 = pneg %p555_p9 }
 0x160   : > { %p562_p7 = por %p561_p12, %p560_p11 }
 0x162   : > { %p563_p3 = pnand %p562_p7, %p556_p10 }
 0x164   : > { %566 = shalt.err (!%p563_p3)
}
 0x165   : > { %s620_s27 = smov 128   ;;  %s621_s8 = smov 8  }
 0x166   : > { %437 = dma.vmem_to_hbm [thread:$0]  (%p865_p13), %s800_s16, 256, %s805_s23, %s307_s3, %s620_s27, %s620_s27, %s621_s8  }
 0x167 PF: > { %s335_s14 = sand.u32 1, %s597_s9   ;;  %p866_p6 = scmp.ne.s32.totalorder %s858_s22, 0 }
 0x168   : > { %p867_p4 = scmp.ge.s32.totalorder %s609_s12, 2  ;;  %s336_s17 = scalar_lea.sflag [#allocation5], %s335_s14 }
 0x16a   : > { %p448_p5 = pnand %p867_p4, %p866_p6 }
 0x16c   : > { %592 = dma.done.wait (!%p448_p5), %s336_s17, 256  }
 0x16d   : > { %594 = vsyncadd (!%p448_p5), %s336_s17, 4294967040  ;;  %p16_p0 = scmp.ge.s32.totalorder %s662_s15, 4   ;;  %s868_s9 = smov %s601_s10 }
 0x16e   : > { %s869_s10 = smov %s605_s11  ;;  %s870_s11 = smov %s674_s18 }
 0x16f   : > { %s871_s12 = smov %s662_s15  ;;  %18 = sbr.rel (!%p16_p0) target bundleno = 6 (0x6), region = 78 }
 0x176   :  { %341 = vsyncpa [#allocation4], 1 }
 0x177   :  { %343 = vsyncpa [#allocation4 + $0x1], 1 }
 0x178   :  { %344 = vsyncpa [#allocation5], 1 }
 0x179   :  { %346 = vsyncpa [#allocation5 + $0x1], 1 }
 0x17a   :  { %347 = vsyncpa [#allocation6], 1 }
 0x17b   :  { %349 = vsyncpa [#allocation6 + $0x1], 1 }

</bundles_post_ra>
